<compile_context>
chip_gen: v5e
topology: v5e:2x2
jax: 0.10.0
libtpu: 0.0.40
codegen_flags: <defaults>
</compile_context>

<pallas_src>
import functools

import jax
import jax.numpy as jnp
from jax import lax
from jax.experimental import pallas as pl
from jax.experimental.pallas import tpu as pltpu


# ----------------------------------------------------------------------------
# Fused kernel: word-row DMA gather + resident pos/type tables -> sum -> LayerNorm
# ----------------------------------------------------------------------------
def _bert_embeddings_kernel(wid_ref,                     # scalar prefetch: (N,) int32 (SMEM)
                            pid_ref, tid_ref,            # (TILE_S, 1) int32 (VMEM)
                            pos_ref, type_ref,           # (P, H), (TV, H) resident tables
                            gamma_ref, beta_ref,         # (1, H) LayerNorm params
                            word_hbm,                    # (V, H) word table in HBM (pl.ANY)
                            out_ref,                     # (1, TILE_S, H)
                            wbuf, sem,                   # VMEM (TILE_S, H), DMA sems (TILE_S,)
                            *, seq_tiles, tile_s, eps):
    b = pl.program_id(0)
    s = pl.program_id(1)
    base = (b * seq_tiles + s) * tile_s

    # ---- word rows: issue all TILE_S row DMAs, then wait (all in flight) ----
    copies = []
    for r in range(tile_s):                      # static unroll: back-to-back DMA issue
        row = wid_ref[base + r]
        cp = pltpu.make_async_copy(word_hbm.at[row], wbuf.at[r], sem.at[r])
        cp.start()
        copies.append(cp)
    for cp in copies:
        cp.wait()
    words = wbuf[...].astype(jnp.float32)                                   # (T, H)

    # ---- position rows: resident table + one-hot matmul (MXU is otherwise idle) ----
    P = pos_ref.shape[0]
    pos_oh = (pid_ref[...] ==
              lax.broadcasted_iota(jnp.int32, (tile_s, P), 1)).astype(jnp.float32)
    pos = jnp.dot(pos_oh, pos_ref[...].astype(jnp.float32),
                  preferred_element_type=jnp.float32)                       # (T, H)

    # ---- token-type rows: tiny resident table + select-accumulate (VPU) ----
    TV = type_ref.shape[0]
    tid = tid_ref[...]                                                      # (T, 1)
    typ = jnp.zeros_like(pos)
    for t in range(TV):
        row_t = type_ref[pl.ds(t, 1), :].astype(jnp.float32)                # (1, H)
        typ = typ + jnp.where(tid == t, 1.0, 0.0) * row_t

    # ---- sum + LayerNorm (f32 accumulation) ----
    x = words + pos + typ
    mean = jnp.mean(x, axis=-1, keepdims=True)
    xc = x - mean
    var = jnp.mean(xc * xc, axis=-1, keepdims=True)
    inv = lax.rsqrt(var + eps)                                              # EUP slot
    y = (xc * inv * gamma_ref[...].astype(jnp.float32)
         + beta_ref[...].astype(jnp.float32))
    out_ref[...] = y[None].astype(out_ref.dtype)


def bert_embeddings(input_ids, token_type_ids, position_ids,
                    word_table, pos_table, type_table,
                    gamma, beta, *, eps=1e-12, tile_s=None):
    """Fused BertEmbeddings forward. Returns [B, S, H] float32."""
    B, S = input_ids.shape
    V, H = word_table.shape
    P = pos_table.shape[0]
    TV = type_table.shape[0]

    if tile_s is None:
        tile_s = min(S, 128)                     # fat token tile (>= 8, ideally 128+)
    assert S % tile_s == 0, "seq length must be a multiple of the token tile"
    assert tile_s % 8 == 0 or tile_s == S, "token tile should be sublane aligned"
    seq_tiles = S // tile_s
    N = B * S

    wid = input_ids.reshape(N).astype(jnp.int32)           # only SMEM prefetch array
    pid_col = position_ids.reshape(N, 1).astype(jnp.int32)  # VMEM column inputs
    tid_col = token_type_ids.reshape(N, 1).astype(jnp.int32)
    gamma2 = gamma.reshape(1, H)
    beta2 = beta.reshape(1, H)

    grid_spec = pltpu.PrefetchScalarGridSpec(
        num_scalar_prefetch=1,
        grid=(B, seq_tiles),
        in_specs=[
            # per-tile id columns (lane dim = 1 == full array dim, sublane dim % 8 == 0)
            pl.BlockSpec((tile_s, 1), lambda b, s, ids: (b * seq_tiles + s, 0)),
            pl.BlockSpec((tile_s, 1), lambda b, s, ids: (b * seq_tiles + s, 0)),
            # resident tables / params (constant index_map -> DMA'd once, stay in VMEM)
            pl.BlockSpec((P, H), lambda b, s, ids: (0, 0)),
            pl.BlockSpec((TV, H), lambda b, s, ids: (0, 0)),
            pl.BlockSpec((1, H), lambda b, s, ids: (0, 0)),
            pl.BlockSpec((1, H), lambda b, s, ids: (0, 0)),
            # word table stays in HBM; rows gathered with manual DMA inside the kernel
            pl.BlockSpec(memory_space=pl.ANY),
        ],
        out_specs=pl.BlockSpec((1, tile_s, H), lambda b, s, ids: (b, s, 0)),
        scratch_shapes=[
            pltpu.VMEM((tile_s, H), word_table.dtype),
            pltpu.SemaphoreType.DMA((tile_s,)),
        ],
    )

    out = pl.pallas_call(
        functools.partial(_bert_embeddings_kernel,
                          seq_tiles=seq_tiles, tile_s=tile_s, eps=float(eps)),
        out_shape=jax.ShapeDtypeStruct((B, S, H), jnp.float32),
        grid_spec=grid_spec,
        compiler_params=pltpu.CompilerParams(
            dimension_semantics=("parallel", "parallel")),
    )(wid, pid_col, tid_col, pos_table, type_table, gamma2, beta2, word_table)

    return out


# ----------------------------------------------------------------------------
# Module-style wrapper (mirrors BertEmbeddings.forward)
# ----------------------------------------------------------------------------
class BertEmbeddings:
    def __init__(self, vocab_size, hidden_size, max_position_embeddings,
                 type_vocab_size, layer_norm_eps, key):
        k_w, k_p, k_t, k_g, k_b = jax.random.split(key, 5)
        self.eps = layer_norm_eps
        self.word_table = 0.02 * jax.random.normal(
            k_w, (vocab_size, hidden_size), dtype=jnp.float32)
        # nn.Embedding(padding_idx=0): row 0 is zero.
        self.word_table = self.word_table.at[0].set(0.0)
        self.pos_table = 0.02 * jax.random.normal(
            k_p, (max_position_embeddings, hidden_size), dtype=jnp.float32)
        self.type_table = 0.02 * jax.random.normal(
            k_t, (type_vocab_size, hidden_size), dtype=jnp.float32)
        self.gamma = (jnp.ones((hidden_size,), jnp.float32)
                      + 0.1 * jax.random.normal(k_g, (hidden_size,), dtype=jnp.float32))
        self.beta = 0.1 * jax.random.normal(k_b, (hidden_size,), dtype=jnp.float32)

    def __call__(self, input_ids, token_type_ids=None, position_ids=None):
        B, S = input_ids.shape
        if position_ids is None:
            position_ids = jnp.broadcast_to(jnp.arange(S, dtype=jnp.int32), (B, S))
        if token_type_ids is None:
            token_type_ids = jnp.zeros((B, S), dtype=jnp.int32)
        # TODO(synk): training-mode dropout (hidden_dropout_prob) not implemented;
        # nn.Dropout is identity at inference.
        return bert_embeddings(input_ids, token_type_ids, position_ids,
                               self.word_table, self.pos_table, self.type_table,
                               self.gamma, self.beta, eps=self.eps)


if __name__ == "__main__":
    key = jax.random.PRNGKey(0)
    k_param, k_ids, k_types = jax.random.split(key, 3)

    B, S, H = 2, 8, 128                      # batch, seq, hidden (lane-dense)
    vocab_size, max_pos, type_vocab = 64, 16, 2
    eps = 1e-12

    model = BertEmbeddings(vocab_size=vocab_size, hidden_size=H,
                           max_position_embeddings=max_pos,
                           type_vocab_size=type_vocab,
                           layer_norm_eps=eps, key=k_param)

    input_ids = jax.random.randint(k_ids, (B, S), 0, vocab_size)
    token_type_ids = jax.random.randint(k_types, (B, S), 0, type_vocab)
    position_ids = jnp.broadcast_to(jnp.arange(S, dtype=jnp.int32), (B, S))

    out = model(input_ids, token_type_ids=token_type_ids, position_ids=position_ids)
    out = jax.block_until_ready(out)

    # Plain-JAX reference.
    emb = (model.word_table[input_ids]
           + model.pos_table[position_ids]
           + model.type_table[token_type_ids])
    mean = emb.mean(-1, keepdims=True)
    var = ((emb - mean) ** 2).mean(-1, keepdims=True)
    ref = (emb - mean) / jnp.sqrt(var + eps) * model.gamma + model.beta

    assert out.shape == (B, S, H)
    err = float(jnp.max(jnp.abs(out - ref)))
    assert jnp.allclose(out, ref, atol=1e-5, rtol=1e-5), err

    # Also exercise the default-argument path (token_type_ids / position_ids = None).
    out_default = jax.block_until_ready(model(input_ids))
    emb_d = (model.word_table[input_ids]
             + model.pos_table[position_ids]
             + model.type_table[jnp.zeros((B, S), jnp.int32)])
    mean_d = emb_d.mean(-1, keepdims=True)
    var_d = ((emb_d - mean_d) ** 2).mean(-1, keepdims=True)
    ref_d = (emb_d - mean_d) / jnp.sqrt(var_d + eps) * model.gamma + model.beta
    assert jnp.allclose(out_default, ref_d, atol=1e-5, rtol=1e-5)

    print("KERNEL_OK")
</pallas_src>

<mosaic_0001>
module attributes {stable_mosaic.version = 11 : i64} {
  func.func @_bert_embeddings_kernel(%arg0: i32, %arg1: i32, %arg2: memref<16xi32, #tpu.memory_space<smem>>, %arg3: memref<8x1xi32, #tpu.memory_space<vmem>>, %arg4: memref<8x1xi32, #tpu.memory_space<vmem>>, %arg5: memref<16x128xf32, #tpu.memory_space<vmem>>, %arg6: memref<2x128xf32, #tpu.memory_space<vmem>>, %arg7: memref<1x128xf32, #tpu.memory_space<vmem>>, %arg8: memref<1x128xf32, #tpu.memory_space<vmem>>, %arg9: memref<64x128xf32, #tpu.memory_space<any>>, %arg10: memref<1x8x128xf32, #tpu.memory_space<vmem>>, %arg11: memref<8x128xf32, #tpu.memory_space<vmem>>, %arg12: memref<8x!tpu.dma_semaphore, #tpu.memory_space<semaphore_mem>>) attributes {dimension_semantics = [#tpu.dimension_semantics<parallel>, #tpu.dimension_semantics<parallel>], iteration_bounds = array<i64: 2, 1>, scalar_prefetch = 1 : i64, scratch_operands = 2 : i64, tpu.core_type = #tpu.core_type<tc>, window_params = [{transform_indices = @transform_0, window_bounds = array<i64: 8, 1>}, {transform_indices = @transform_1, window_bounds = array<i64: 8, 1>}, {pipeline_mode = #tpu.pipeline_mode<synchronous>, transform_indices = @transform_2, window_bounds = array<i64: 16, 128>}, {pipeline_mode = #tpu.pipeline_mode<synchronous>, transform_indices = @transform_3, window_bounds = array<i64: 2, 128>}, {pipeline_mode = #tpu.pipeline_mode<synchronous>, transform_indices = @transform_4, window_bounds = array<i64: 1, 128>}, {pipeline_mode = #tpu.pipeline_mode<synchronous>, transform_indices = @transform_5, window_bounds = array<i64: 1, 128>}, {}, {transform_indices = @transform_7, window_bounds = array<i64: 1, 8, 128>}]} {
    %c1_i32 = arith.constant 1 : i32
    %0 = arith.muli %arg0, %c1_i32 : i32
    %1 = arith.addi %0, %arg1 : i32
    %c8_i32 = arith.constant 8 : i32
    %2 = arith.muli %1, %c8_i32 : i32
    %c0_i32 = arith.constant 0 : i32
    %3 = arith.addi %2, %c0_i32 : i32
    %4 = arith.index_cast %3 : i32 to index
    %5 = memref.load %arg2[%4] : memref<16xi32, #tpu.memory_space<smem>>
    %c0_i32_0 = arith.constant 0 : i32
    %c0_i32_1 = arith.constant 0 : i32
    %c0_i32_2 = arith.constant 0 : i32
    %6 = tpu.memref_slice %arg9[%5, %c0_i32_2] : memref<64x128xf32, #tpu.memory_space<any>> -> memref<1x128xf32, #tpu.memory_space<any>>
    %7 = tpu.memref_squeeze %6 : memref<1x128xf32, #tpu.memory_space<any>> -> memref<128xf32, #tpu.memory_space<any>>
    %c0_i32_3 = arith.constant 0 : i32
    %8 = tpu.memref_slice %arg11[%c0_i32_0, %c0_i32_3] : memref<8x128xf32, #tpu.memory_space<vmem>> -> memref<1x128xf32, #tpu.memory_space<vmem>>
    %9 = tpu.memref_squeeze %8 : memref<1x128xf32, #tpu.memory_space<vmem>> -> memref<128xf32, #tpu.memory_space<vmem>>
    %10 = tpu.memref_slice %arg12[%c0_i32_1] : memref<8x!tpu.dma_semaphore, #tpu.memory_space<semaphore_mem>> -> memref<1x!tpu.dma_semaphore, #tpu.memory_space<semaphore_mem>>
    %11 = tpu.memref_squeeze %10 : memref<1x!tpu.dma_semaphore, #tpu.memory_space<semaphore_mem>> -> memref<!tpu.dma_semaphore, #tpu.memory_space<semaphore_mem>>
    tpu.enqueue_dma source(%7 : memref<128xf32, #tpu.memory_space<any>>) target(%9 : memref<128xf32, #tpu.memory_space<vmem>>) target_semaphore(%11 : memref<!tpu.dma_semaphore, #tpu.memory_space<semaphore_mem>>)
    %c1_i32_4 = arith.constant 1 : i32
    %12 = arith.addi %2, %c1_i32_4 : i32
    %13 = arith.index_cast %12 : i32 to index
    %14 = memref.load %arg2[%13] : memref<16xi32, #tpu.memory_space<smem>>
    %c1_i32_5 = arith.constant 1 : i32
    %c1_i32_6 = arith.constant 1 : i32
    %c0_i32_7 = arith.constant 0 : i32
    %15 = tpu.memref_slice %arg9[%14, %c0_i32_7] : memref<64x128xf32, #tpu.memory_space<any>> -> memref<1x128xf32, #tpu.memory_space<any>>
    %16 = tpu.memref_squeeze %15 : memref<1x128xf32, #tpu.memory_space<any>> -> memref<128xf32, #tpu.memory_space<any>>
    %c0_i32_8 = arith.constant 0 : i32
    %17 = tpu.memref_slice %arg11[%c1_i32_5, %c0_i32_8] : memref<8x128xf32, #tpu.memory_space<vmem>> -> memref<1x128xf32, #tpu.memory_space<vmem>>
    %18 = tpu.memref_squeeze %17 : memref<1x128xf32, #tpu.memory_space<vmem>> -> memref<128xf32, #tpu.memory_space<vmem>>
    %19 = tpu.memref_slice %arg12[%c1_i32_6] : memref<8x!tpu.dma_semaphore, #tpu.memory_space<semaphore_mem>> -> memref<1x!tpu.dma_semaphore, #tpu.memory_space<semaphore_mem>>
    %20 = tpu.memref_squeeze %19 : memref<1x!tpu.dma_semaphore, #tpu.memory_space<semaphore_mem>> -> memref<!tpu.dma_semaphore, #tpu.memory_space<semaphore_mem>>
    tpu.enqueue_dma source(%16 : memref<128xf32, #tpu.memory_space<any>>) target(%18 : memref<128xf32, #tpu.memory_space<vmem>>) target_semaphore(%20 : memref<!tpu.dma_semaphore, #tpu.memory_space<semaphore_mem>>)
    %c2_i32 = arith.constant 2 : i32
    %21 = arith.addi %2, %c2_i32 : i32
    %22 = arith.index_cast %21 : i32 to index
    %23 = memref.load %arg2[%22] : memref<16xi32, #tpu.memory_space<smem>>
    %c2_i32_9 = arith.constant 2 : i32
    %c2_i32_10 = arith.constant 2 : i32
    %c0_i32_11 = arith.constant 0 : i32
    %24 = tpu.memref_slice %arg9[%23, %c0_i32_11] : memref<64x128xf32, #tpu.memory_space<any>> -> memref<1x128xf32, #tpu.memory_space<any>>
    %25 = tpu.memref_squeeze %24 : memref<1x128xf32, #tpu.memory_space<any>> -> memref<128xf32, #tpu.memory_space<any>>
    %c0_i32_12 = arith.constant 0 : i32
    %26 = tpu.memref_slice %arg11[%c2_i32_9, %c0_i32_12] : memref<8x128xf32, #tpu.memory_space<vmem>> -> memref<1x128xf32, #tpu.memory_space<vmem>>
    %27 = tpu.memref_squeeze %26 : memref<1x128xf32, #tpu.memory_space<vmem>> -> memref<128xf32, #tpu.memory_space<vmem>>
    %28 = tpu.memref_slice %arg12[%c2_i32_10] : memref<8x!tpu.dma_semaphore, #tpu.memory_space<semaphore_mem>> -> memref<1x!tpu.dma_semaphore, #tpu.memory_space<semaphore_mem>>
    %29 = tpu.memref_squeeze %28 : memref<1x!tpu.dma_semaphore, #tpu.memory_space<semaphore_mem>> -> memref<!tpu.dma_semaphore, #tpu.memory_space<semaphore_mem>>
    tpu.enqueue_dma source(%25 : memref<128xf32, #tpu.memory_space<any>>) target(%27 : memref<128xf32, #tpu.memory_space<vmem>>) target_semaphore(%29 : memref<!tpu.dma_semaphore, #tpu.memory_space<semaphore_mem>>)
    %c3_i32 = arith.constant 3 : i32
    %30 = arith.addi %2, %c3_i32 : i32
    %31 = arith.index_cast %30 : i32 to index
    %32 = memref.load %arg2[%31] : memref<16xi32, #tpu.memory_space<smem>>
    %c3_i32_13 = arith.constant 3 : i32
    %c3_i32_14 = arith.constant 3 : i32
    %c0_i32_15 = arith.constant 0 : i32
    %33 = tpu.memref_slice %arg9[%32, %c0_i32_15] : memref<64x128xf32, #tpu.memory_space<any>> -> memref<1x128xf32, #tpu.memory_space<any>>
    %34 = tpu.memref_squeeze %33 : memref<1x128xf32, #tpu.memory_space<any>> -> memref<128xf32, #tpu.memory_space<any>>
    %c0_i32_16 = arith.constant 0 : i32
    %35 = tpu.memref_slice %arg11[%c3_i32_13, %c0_i32_16] : memref<8x128xf32, #tpu.memory_space<vmem>> -> memref<1x128xf32, #tpu.memory_space<vmem>>
    %36 = tpu.memref_squeeze %35 : memref<1x128xf32, #tpu.memory_space<vmem>> -> memref<128xf32, #tpu.memory_space<vmem>>
    %37 = tpu.memref_slice %arg12[%c3_i32_14] : memref<8x!tpu.dma_semaphore, #tpu.memory_space<semaphore_mem>> -> memref<1x!tpu.dma_semaphore, #tpu.memory_space<semaphore_mem>>
    %38 = tpu.memref_squeeze %37 : memref<1x!tpu.dma_semaphore, #tpu.memory_space<semaphore_mem>> -> memref<!tpu.dma_semaphore, #tpu.memory_space<semaphore_mem>>
    tpu.enqueue_dma source(%34 : memref<128xf32, #tpu.memory_space<any>>) target(%36 : memref<128xf32, #tpu.memory_space<vmem>>) target_semaphore(%38 : memref<!tpu.dma_semaphore, #tpu.memory_space<semaphore_mem>>)
    %c4_i32 = arith.constant 4 : i32
    %39 = arith.addi %2, %c4_i32 : i32
    %40 = arith.index_cast %39 : i32 to index
    %41 = memref.load %arg2[%40] : memref<16xi32, #tpu.memory_space<smem>>
    %c4_i32_17 = arith.constant 4 : i32
    %c4_i32_18 = arith.constant 4 : i32
    %c0_i32_19 = arith.constant 0 : i32
    %42 = tpu.memref_slice %arg9[%41, %c0_i32_19] : memref<64x128xf32, #tpu.memory_space<any>> -> memref<1x128xf32, #tpu.memory_space<any>>
    %43 = tpu.memref_squeeze %42 : memref<1x128xf32, #tpu.memory_space<any>> -> memref<128xf32, #tpu.memory_space<any>>
    %c0_i32_20 = arith.constant 0 : i32
    %44 = tpu.memref_slice %arg11[%c4_i32_17, %c0_i32_20] : memref<8x128xf32, #tpu.memory_space<vmem>> -> memref<1x128xf32, #tpu.memory_space<vmem>>
    %45 = tpu.memref_squeeze %44 : memref<1x128xf32, #tpu.memory_space<vmem>> -> memref<128xf32, #tpu.memory_space<vmem>>
    %46 = tpu.memref_slice %arg12[%c4_i32_18] : memref<8x!tpu.dma_semaphore, #tpu.memory_space<semaphore_mem>> -> memref<1x!tpu.dma_semaphore, #tpu.memory_space<semaphore_mem>>
    %47 = tpu.memref_squeeze %46 : memref<1x!tpu.dma_semaphore, #tpu.memory_space<semaphore_mem>> -> memref<!tpu.dma_semaphore, #tpu.memory_space<semaphore_mem>>
    tpu.enqueue_dma source(%43 : memref<128xf32, #tpu.memory_space<any>>) target(%45 : memref<128xf32, #tpu.memory_space<vmem>>) target_semaphore(%47 : memref<!tpu.dma_semaphore, #tpu.memory_space<semaphore_mem>>)
    %c5_i32 = arith.constant 5 : i32
    %48 = arith.addi %2, %c5_i32 : i32
    %49 = arith.index_cast %48 : i32 to index
    %50 = memref.load %arg2[%49] : memref<16xi32, #tpu.memory_space<smem>>
    %c5_i32_21 = arith.constant 5 : i32
    %c5_i32_22 = arith.constant 5 : i32
    %c0_i32_23 = arith.constant 0 : i32
    %51 = tpu.memref_slice %arg9[%50, %c0_i32_23] : memref<64x128xf32, #tpu.memory_space<any>> -> memref<1x128xf32, #tpu.memory_space<any>>
    %52 = tpu.memref_squeeze %51 : memref<1x128xf32, #tpu.memory_space<any>> -> memref<128xf32, #tpu.memory_space<any>>
    %c0_i32_24 = arith.constant 0 : i32
    %53 = tpu.memref_slice %arg11[%c5_i32_21, %c0_i32_24] : memref<8x128xf32, #tpu.memory_space<vmem>> -> memref<1x128xf32, #tpu.memory_space<vmem>>
    %54 = tpu.memref_squeeze %53 : memref<1x128xf32, #tpu.memory_space<vmem>> -> memref<128xf32, #tpu.memory_space<vmem>>
    %55 = tpu.memref_slice %arg12[%c5_i32_22] : memref<8x!tpu.dma_semaphore, #tpu.memory_space<semaphore_mem>> -> memref<1x!tpu.dma_semaphore, #tpu.memory_space<semaphore_mem>>
    %56 = tpu.memref_squeeze %55 : memref<1x!tpu.dma_semaphore, #tpu.memory_space<semaphore_mem>> -> memref<!tpu.dma_semaphore, #tpu.memory_space<semaphore_mem>>
    tpu.enqueue_dma source(%52 : memref<128xf32, #tpu.memory_space<any>>) target(%54 : memref<128xf32, #tpu.memory_space<vmem>>) target_semaphore(%56 : memref<!tpu.dma_semaphore, #tpu.memory_space<semaphore_mem>>)
    %c6_i32 = arith.constant 6 : i32
    %57 = arith.addi %2, %c6_i32 : i32
    %58 = arith.index_cast %57 : i32 to index
    %59 = memref.load %arg2[%58] : memref<16xi32, #tpu.memory_space<smem>>
    %c6_i32_25 = arith.constant 6 : i32
    %c6_i32_26 = arith.constant 6 : i32
    %c0_i32_27 = arith.constant 0 : i32
    %60 = tpu.memref_slice %arg9[%59, %c0_i32_27] : memref<64x128xf32, #tpu.memory_space<any>> -> memref<1x128xf32, #tpu.memory_space<any>>
    %61 = tpu.memref_squeeze %60 : memref<1x128xf32, #tpu.memory_space<any>> -> memref<128xf32, #tpu.memory_space<any>>
    %c0_i32_28 = arith.constant 0 : i32
    %62 = tpu.memref_slice %arg11[%c6_i32_25, %c0_i32_28] : memref<8x128xf32, #tpu.memory_space<vmem>> -> memref<1x128xf32, #tpu.memory_space<vmem>>
    %63 = tpu.memref_squeeze %62 : memref<1x128xf32, #tpu.memory_space<vmem>> -> memref<128xf32, #tpu.memory_space<vmem>>
    %64 = tpu.memref_slice %arg12[%c6_i32_26] : memref<8x!tpu.dma_semaphore, #tpu.memory_space<semaphore_mem>> -> memref<1x!tpu.dma_semaphore, #tpu.memory_space<semaphore_mem>>
    %65 = tpu.memref_squeeze %64 : memref<1x!tpu.dma_semaphore, #tpu.memory_space<semaphore_mem>> -> memref<!tpu.dma_semaphore, #tpu.memory_space<semaphore_mem>>
    tpu.enqueue_dma source(%61 : memref<128xf32, #tpu.memory_space<any>>) target(%63 : memref<128xf32, #tpu.memory_space<vmem>>) target_semaphore(%65 : memref<!tpu.dma_semaphore, #tpu.memory_space<semaphore_mem>>)
    %c7_i32 = arith.constant 7 : i32
    %66 = arith.addi %2, %c7_i32 : i32
    %67 = arith.index_cast %66 : i32 to index
    %68 = memref.load %arg2[%67] : memref<16xi32, #tpu.memory_space<smem>>
    %c7_i32_29 = arith.constant 7 : i32
    %c7_i32_30 = arith.constant 7 : i32
    %c0_i32_31 = arith.constant 0 : i32
    %69 = tpu.memref_slice %arg9[%68, %c0_i32_31] : memref<64x128xf32, #tpu.memory_space<any>> -> memref<1x128xf32, #tpu.memory_space<any>>
    %70 = tpu.memref_squeeze %69 : memref<1x128xf32, #tpu.memory_space<any>> -> memref<128xf32, #tpu.memory_space<any>>
    %c0_i32_32 = arith.constant 0 : i32
    %71 = tpu.memref_slice %arg11[%c7_i32_29, %c0_i32_32] : memref<8x128xf32, #tpu.memory_space<vmem>> -> memref<1x128xf32, #tpu.memory_space<vmem>>
    %72 = tpu.memref_squeeze %71 : memref<1x128xf32, #tpu.memory_space<vmem>> -> memref<128xf32, #tpu.memory_space<vmem>>
    %73 = tpu.memref_slice %arg12[%c7_i32_30] : memref<8x!tpu.dma_semaphore, #tpu.memory_space<semaphore_mem>> -> memref<1x!tpu.dma_semaphore, #tpu.memory_space<semaphore_mem>>
    %74 = tpu.memref_squeeze %73 : memref<1x!tpu.dma_semaphore, #tpu.memory_space<semaphore_mem>> -> memref<!tpu.dma_semaphore, #tpu.memory_space<semaphore_mem>>
    tpu.enqueue_dma source(%70 : memref<128xf32, #tpu.memory_space<any>>) target(%72 : memref<128xf32, #tpu.memory_space<vmem>>) target_semaphore(%74 : memref<!tpu.dma_semaphore, #tpu.memory_space<semaphore_mem>>)
    %c0_i32_33 = arith.constant 0 : i32
    %c0_i32_34 = arith.constant 0 : i32
    %c0_i32_35 = arith.constant 0 : i32
    %75 = tpu.memref_slice %arg9[%5, %c0_i32_35] : memref<64x128xf32, #tpu.memory_space<any>> -> memref<1x128xf32, #tpu.memory_space<any>>
    %76 = tpu.memref_squeeze %75 : memref<1x128xf32, #tpu.memory_space<any>> -> memref<128xf32, #tpu.memory_space<any>>
    %c0_i32_36 = arith.constant 0 : i32
    %77 = tpu.memref_slice %arg11[%c0_i32_33, %c0_i32_36] : memref<8x128xf32, #tpu.memory_space<vmem>> -> memref<1x128xf32, #tpu.memory_space<vmem>>
    %78 = tpu.memref_squeeze %77 : memref<1x128xf32, #tpu.memory_space<vmem>> -> memref<128xf32, #tpu.memory_space<vmem>>
    %79 = tpu.memref_slice %arg12[%c0_i32_34] : memref<8x!tpu.dma_semaphore, #tpu.memory_space<semaphore_mem>> -> memref<1x!tpu.dma_semaphore, #tpu.memory_space<semaphore_mem>>
    %80 = tpu.memref_squeeze %79 : memref<1x!tpu.dma_semaphore, #tpu.memory_space<semaphore_mem>> -> memref<!tpu.dma_semaphore, #tpu.memory_space<semaphore_mem>>
    tpu.wait_dma2 semaphore(%80 : memref<!tpu.dma_semaphore, #tpu.memory_space<semaphore_mem>>) src(%76 : memref<128xf32, #tpu.memory_space<any>>) dst(%78 : memref<128xf32, #tpu.memory_space<vmem>>)
    %c1_i32_37 = arith.constant 1 : i32
    %c1_i32_38 = arith.constant 1 : i32
    %c0_i32_39 = arith.constant 0 : i32
    %81 = tpu.memref_slice %arg9[%14, %c0_i32_39] : memref<64x128xf32, #tpu.memory_space<any>> -> memref<1x128xf32, #tpu.memory_space<any>>
    %82 = tpu.memref_squeeze %81 : memref<1x128xf32, #tpu.memory_space<any>> -> memref<128xf32, #tpu.memory_space<any>>
    %c0_i32_40 = arith.constant 0 : i32
    %83 = tpu.memref_slice %arg11[%c1_i32_37, %c0_i32_40] : memref<8x128xf32, #tpu.memory_space<vmem>> -> memref<1x128xf32, #tpu.memory_space<vmem>>
    %84 = tpu.memref_squeeze %83 : memref<1x128xf32, #tpu.memory_space<vmem>> -> memref<128xf32, #tpu.memory_space<vmem>>
    %85 = tpu.memref_slice %arg12[%c1_i32_38] : memref<8x!tpu.dma_semaphore, #tpu.memory_space<semaphore_mem>> -> memref<1x!tpu.dma_semaphore, #tpu.memory_space<semaphore_mem>>
    %86 = tpu.memref_squeeze %85 : memref<1x!tpu.dma_semaphore, #tpu.memory_space<semaphore_mem>> -> memref<!tpu.dma_semaphore, #tpu.memory_space<semaphore_mem>>
    tpu.wait_dma2 semaphore(%86 : memref<!tpu.dma_semaphore, #tpu.memory_space<semaphore_mem>>) src(%82 : memref<128xf32, #tpu.memory_space<any>>) dst(%84 : memref<128xf32, #tpu.memory_space<vmem>>)
    %c2_i32_41 = arith.constant 2 : i32
    %c2_i32_42 = arith.constant 2 : i32
    %c0_i32_43 = arith.constant 0 : i32
    %87 = tpu.memref_slice %arg9[%23, %c0_i32_43] : memref<64x128xf32, #tpu.memory_space<any>> -> memref<1x128xf32, #tpu.memory_space<any>>
    %88 = tpu.memref_squeeze %87 : memref<1x128xf32, #tpu.memory_space<any>> -> memref<128xf32, #tpu.memory_space<any>>
    %c0_i32_44 = arith.constant 0 : i32
    %89 = tpu.memref_slice %arg11[%c2_i32_41, %c0_i32_44] : memref<8x128xf32, #tpu.memory_space<vmem>> -> memref<1x128xf32, #tpu.memory_space<vmem>>
    %90 = tpu.memref_squeeze %89 : memref<1x128xf32, #tpu.memory_space<vmem>> -> memref<128xf32, #tpu.memory_space<vmem>>
    %91 = tpu.memref_slice %arg12[%c2_i32_42] : memref<8x!tpu.dma_semaphore, #tpu.memory_space<semaphore_mem>> -> memref<1x!tpu.dma_semaphore, #tpu.memory_space<semaphore_mem>>
    %92 = tpu.memref_squeeze %91 : memref<1x!tpu.dma_semaphore, #tpu.memory_space<semaphore_mem>> -> memref<!tpu.dma_semaphore, #tpu.memory_space<semaphore_mem>>
    tpu.wait_dma2 semaphore(%92 : memref<!tpu.dma_semaphore, #tpu.memory_space<semaphore_mem>>) src(%88 : memref<128xf32, #tpu.memory_space<any>>) dst(%90 : memref<128xf32, #tpu.memory_space<vmem>>)
    %c3_i32_45 = arith.constant 3 : i32
    %c3_i32_46 = arith.constant 3 : i32
    %c0_i32_47 = arith.constant 0 : i32
    %93 = tpu.memref_slice %arg9[%32, %c0_i32_47] : memref<64x128xf32, #tpu.memory_space<any>> -> memref<1x128xf32, #tpu.memory_space<any>>
    %94 = tpu.memref_squeeze %93 : memref<1x128xf32, #tpu.memory_space<any>> -> memref<128xf32, #tpu.memory_space<any>>
    %c0_i32_48 = arith.constant 0 : i32
    %95 = tpu.memref_slice %arg11[%c3_i32_45, %c0_i32_48] : memref<8x128xf32, #tpu.memory_space<vmem>> -> memref<1x128xf32, #tpu.memory_space<vmem>>
    %96 = tpu.memref_squeeze %95 : memref<1x128xf32, #tpu.memory_space<vmem>> -> memref<128xf32, #tpu.memory_space<vmem>>
    %97 = tpu.memref_slice %arg12[%c3_i32_46] : memref<8x!tpu.dma_semaphore, #tpu.memory_space<semaphore_mem>> -> memref<1x!tpu.dma_semaphore, #tpu.memory_space<semaphore_mem>>
    %98 = tpu.memref_squeeze %97 : memref<1x!tpu.dma_semaphore, #tpu.memory_space<semaphore_mem>> -> memref<!tpu.dma_semaphore, #tpu.memory_space<semaphore_mem>>
    tpu.wait_dma2 semaphore(%98 : memref<!tpu.dma_semaphore, #tpu.memory_space<semaphore_mem>>) src(%94 : memref<128xf32, #tpu.memory_space<any>>) dst(%96 : memref<128xf32, #tpu.memory_space<vmem>>)
    %c4_i32_49 = arith.constant 4 : i32
    %c4_i32_50 = arith.constant 4 : i32
    %c0_i32_51 = arith.constant 0 : i32
    %99 = tpu.memref_slice %arg9[%41, %c0_i32_51] : memref<64x128xf32, #tpu.memory_space<any>> -> memref<1x128xf32, #tpu.memory_space<any>>
    %100 = tpu.memref_squeeze %99 : memref<1x128xf32, #tpu.memory_space<any>> -> memref<128xf32, #tpu.memory_space<any>>
    %c0_i32_52 = arith.constant 0 : i32
    %101 = tpu.memref_slice %arg11[%c4_i32_49, %c0_i32_52] : memref<8x128xf32, #tpu.memory_space<vmem>> -> memref<1x128xf32, #tpu.memory_space<vmem>>
    %102 = tpu.memref_squeeze %101 : memref<1x128xf32, #tpu.memory_space<vmem>> -> memref<128xf32, #tpu.memory_space<vmem>>
    %103 = tpu.memref_slice %arg12[%c4_i32_50] : memref<8x!tpu.dma_semaphore, #tpu.memory_space<semaphore_mem>> -> memref<1x!tpu.dma_semaphore, #tpu.memory_space<semaphore_mem>>
    %104 = tpu.memref_squeeze %103 : memref<1x!tpu.dma_semaphore, #tpu.memory_space<semaphore_mem>> -> memref<!tpu.dma_semaphore, #tpu.memory_space<semaphore_mem>>
    tpu.wait_dma2 semaphore(%104 : memref<!tpu.dma_semaphore, #tpu.memory_space<semaphore_mem>>) src(%100 : memref<128xf32, #tpu.memory_space<any>>) dst(%102 : memref<128xf32, #tpu.memory_space<vmem>>)
    %c5_i32_53 = arith.constant 5 : i32
    %c5_i32_54 = arith.constant 5 : i32
    %c0_i32_55 = arith.constant 0 : i32
    %105 = tpu.memref_slice %arg9[%50, %c0_i32_55] : memref<64x128xf32, #tpu.memory_space<any>> -> memref<1x128xf32, #tpu.memory_space<any>>
    %106 = tpu.memref_squeeze %105 : memref<1x128xf32, #tpu.memory_space<any>> -> memref<128xf32, #tpu.memory_space<any>>
    %c0_i32_56 = arith.constant 0 : i32
    %107 = tpu.memref_slice %arg11[%c5_i32_53, %c0_i32_56] : memref<8x128xf32, #tpu.memory_space<vmem>> -> memref<1x128xf32, #tpu.memory_space<vmem>>
    %108 = tpu.memref_squeeze %107 : memref<1x128xf32, #tpu.memory_space<vmem>> -> memref<128xf32, #tpu.memory_space<vmem>>
    %109 = tpu.memref_slice %arg12[%c5_i32_54] : memref<8x!tpu.dma_semaphore, #tpu.memory_space<semaphore_mem>> -> memref<1x!tpu.dma_semaphore, #tpu.memory_space<semaphore_mem>>
    %110 = tpu.memref_squeeze %109 : memref<1x!tpu.dma_semaphore, #tpu.memory_space<semaphore_mem>> -> memref<!tpu.dma_semaphore, #tpu.memory_space<semaphore_mem>>
    tpu.wait_dma2 semaphore(%110 : memref<!tpu.dma_semaphore, #tpu.memory_space<semaphore_mem>>) src(%106 : memref<128xf32, #tpu.memory_space<any>>) dst(%108 : memref<128xf32, #tpu.memory_space<vmem>>)
    %c6_i32_57 = arith.constant 6 : i32
    %c6_i32_58 = arith.constant 6 : i32
    %c0_i32_59 = arith.constant 0 : i32
    %111 = tpu.memref_slice %arg9[%59, %c0_i32_59] : memref<64x128xf32, #tpu.memory_space<any>> -> memref<1x128xf32, #tpu.memory_space<any>>
    %112 = tpu.memref_squeeze %111 : memref<1x128xf32, #tpu.memory_space<any>> -> memref<128xf32, #tpu.memory_space<any>>
    %c0_i32_60 = arith.constant 0 : i32
    %113 = tpu.memref_slice %arg11[%c6_i32_57, %c0_i32_60] : memref<8x128xf32, #tpu.memory_space<vmem>> -> memref<1x128xf32, #tpu.memory_space<vmem>>
    %114 = tpu.memref_squeeze %113 : memref<1x128xf32, #tpu.memory_space<vmem>> -> memref<128xf32, #tpu.memory_space<vmem>>
    %115 = tpu.memref_slice %arg12[%c6_i32_58] : memref<8x!tpu.dma_semaphore, #tpu.memory_space<semaphore_mem>> -> memref<1x!tpu.dma_semaphore, #tpu.memory_space<semaphore_mem>>
    %116 = tpu.memref_squeeze %115 : memref<1x!tpu.dma_semaphore, #tpu.memory_space<semaphore_mem>> -> memref<!tpu.dma_semaphore, #tpu.memory_space<semaphore_mem>>
    tpu.wait_dma2 semaphore(%116 : memref<!tpu.dma_semaphore, #tpu.memory_space<semaphore_mem>>) src(%112 : memref<128xf32, #tpu.memory_space<any>>) dst(%114 : memref<128xf32, #tpu.memory_space<vmem>>)
    %c7_i32_61 = arith.constant 7 : i32
    %c7_i32_62 = arith.constant 7 : i32
    %c0_i32_63 = arith.constant 0 : i32
    %117 = tpu.memref_slice %arg9[%68, %c0_i32_63] : memref<64x128xf32, #tpu.memory_space<any>> -> memref<1x128xf32, #tpu.memory_space<any>>
    %118 = tpu.memref_squeeze %117 : memref<1x128xf32, #tpu.memory_space<any>> -> memref<128xf32, #tpu.memory_space<any>>
    %c0_i32_64 = arith.constant 0 : i32
    %119 = tpu.memref_slice %arg11[%c7_i32_61, %c0_i32_64] : memref<8x128xf32, #tpu.memory_space<vmem>> -> memref<1x128xf32, #tpu.memory_space<vmem>>
    %120 = tpu.memref_squeeze %119 : memref<1x128xf32, #tpu.memory_space<vmem>> -> memref<128xf32, #tpu.memory_space<vmem>>
    %121 = tpu.memref_slice %arg12[%c7_i32_62] : memref<8x!tpu.dma_semaphore, #tpu.memory_space<semaphore_mem>> -> memref<1x!tpu.dma_semaphore, #tpu.memory_space<semaphore_mem>>
    %122 = tpu.memref_squeeze %121 : memref<1x!tpu.dma_semaphore, #tpu.memory_space<semaphore_mem>> -> memref<!tpu.dma_semaphore, #tpu.memory_space<semaphore_mem>>
    tpu.wait_dma2 semaphore(%122 : memref<!tpu.dma_semaphore, #tpu.memory_space<semaphore_mem>>) src(%118 : memref<128xf32, #tpu.memory_space<any>>) dst(%120 : memref<128xf32, #tpu.memory_space<vmem>>)
    %c0 = arith.constant 0 : index
    %c0_65 = arith.constant 0 : index
    %123 = vector.load %arg11[%c0, %c0_65] : memref<8x128xf32, #tpu.memory_space<vmem>>, vector<8x128xf32>
    %c0_66 = arith.constant 0 : index
    %c0_67 = arith.constant 0 : index
    %124 = vector.load %arg3[%c0_66, %c0_67] : memref<8x1xi32, #tpu.memory_space<vmem>>, vector<8x1xi32>
    %125 = tpu.iota {dimensions = array<i32: 1>} : vector<8x16xi32>
    %126 = vector.broadcast %124 : vector<8x1xi32> to vector<8x16xi32>
    %127 = arith.cmpi eq, %126, %125 : vector<8x16xi32>
    %128 = arith.extui %127 : vector<8x16xi1> to vector<8x16xi32>
    %129 = arith.sitofp %128 : vector<8x16xi32> to vector<8x16xf32>
    %c0_68 = arith.constant 0 : index
    %c0_69 = arith.constant 0 : index
    %130 = vector.load %arg5[%c0_68, %c0_69] : memref<16x128xf32, #tpu.memory_space<vmem>>, vector<16x128xf32>
    %cst = arith.constant dense<0.000000e+00> : vector<8x128xf32>
    %131 = tpu.matmul %129, %130, %cst {dimension_numbers = #tpu.dot_dimension_numbers<[1], [0], [0], [1], [0, 0, 1, 1], [], []>} : vector<8x16xf32>, vector<16x128xf32>, vector<8x128xf32> -> vector<8x128xf32>
    %c0_70 = arith.constant 0 : index
    %c0_71 = arith.constant 0 : index
    %132 = vector.load %arg4[%c0_70, %c0_71] : memref<8x1xi32, #tpu.memory_space<vmem>>, vector<8x1xi32>
    %cst_72 = arith.constant 0.000000e+00 : f32
    %133 = vector.broadcast %cst_72 : f32 to vector<8x128xf32>
    %c0_73 = arith.constant 0 : index
    %c0_74 = arith.constant 0 : index
    %134 = vector.load %arg6[%c0_73, %c0_74] : memref<2x128xf32, #tpu.memory_space<vmem>>, vector<1x128xf32>
    %c0_i32_75 = arith.constant 0 : i32
    %135 = vector.broadcast %c0_i32_75 : i32 to vector<8x1xi32>
    %136 = arith.cmpi eq, %132, %135 : vector<8x1xi32>
    %cst_76 = arith.constant 1.000000e+00 : f32
    %cst_77 = arith.constant 0.000000e+00 : f32
    %137 = vector.broadcast %cst_76 : f32 to vector<8x1xf32>
    %138 = vector.broadcast %cst_77 : f32 to vector<8x1xf32>
    %139 = arith.select %136, %137, %138 : vector<8x1xi1>, vector<8x1xf32>
    %140 = vector.broadcast %139 : vector<8x1xf32> to vector<8x128xf32>
    %141 = vector.broadcast %134 : vector<1x128xf32> to vector<8x128xf32>
    %142 = arith.mulf %140, %141 : vector<8x128xf32>
    %143 = arith.addf %133, %142 : vector<8x128xf32>
    %c1 = arith.constant 1 : index
    %c0_78 = arith.constant 0 : index
    %144 = vector.load %arg6[%c1, %c0_78] : memref<2x128xf32, #tpu.memory_space<vmem>>, vector<1x128xf32>
    %c1_i32_79 = arith.constant 1 : i32
    %145 = vector.broadcast %c1_i32_79 : i32 to vector<8x1xi32>
    %146 = arith.cmpi eq, %132, %145 : vector<8x1xi32>
    %cst_80 = arith.constant 1.000000e+00 : f32
    %cst_81 = arith.constant 0.000000e+00 : f32
    %147 = vector.broadcast %cst_80 : f32 to vector<8x1xf32>
    %148 = vector.broadcast %cst_81 : f32 to vector<8x1xf32>
    %149 = arith.select %146, %147, %148 : vector<8x1xi1>, vector<8x1xf32>
    %150 = vector.broadcast %149 : vector<8x1xf32> to vector<8x128xf32>
    %151 = vector.broadcast %144 : vector<1x128xf32> to vector<8x128xf32>
    %152 = arith.mulf %150, %151 : vector<8x128xf32>
    %153 = arith.addf %143, %152 : vector<8x128xf32>
    %154 = arith.addf %123, %131 : vector<8x128xf32>
    %155 = arith.addf %154, %153 : vector<8x128xf32>
    %cst_82 = arith.constant dense<0.000000e+00> : vector<8xf32>
    %156 = vector.multi_reduction <add>, %155, %cst_82 [1] : vector<8x128xf32> to vector<8xf32>
    %157 = vector.shape_cast %156 : vector<8xf32> to vector<8x1xf32>
    %cst_83 = arith.constant 1.280000e+02 : f32
    %158 = vector.broadcast %cst_83 : f32 to vector<8x1xf32>
    %159 = arith.divf %157, %158 : vector<8x1xf32>
    %160 = vector.broadcast %159 : vector<8x1xf32> to vector<8x128xf32>
    %161 = arith.subf %155, %160 : vector<8x128xf32>
    %162 = arith.mulf %161, %161 : vector<8x128xf32>
    %cst_84 = arith.constant dense<0.000000e+00> : vector<8xf32>
    %163 = vector.multi_reduction <add>, %162, %cst_84 [1] : vector<8x128xf32> to vector<8xf32>
    %164 = vector.shape_cast %163 : vector<8xf32> to vector<8x1xf32>
    %cst_85 = arith.constant 1.280000e+02 : f32
    %165 = vector.broadcast %cst_85 : f32 to vector<8x1xf32>
    %166 = arith.divf %164, %165 : vector<8x1xf32>
    %cst_86 = arith.constant 9.99999996E-13 : f32
    %167 = vector.broadcast %cst_86 : f32 to vector<8x1xf32>
    %168 = arith.addf %166, %167 : vector<8x1xf32>
    %169 = math.rsqrt %168 : vector<8x1xf32>
    %170 = vector.broadcast %169 : vector<8x1xf32> to vector<8x128xf32>
    %171 = arith.mulf %161, %170 : vector<8x128xf32>
    %c0_87 = arith.constant 0 : index
    %c0_88 = arith.constant 0 : index
    %172 = vector.load %arg7[%c0_87, %c0_88] : memref<1x128xf32, #tpu.memory_space<vmem>>, vector<1x128xf32>
    %173 = vector.broadcast %172 : vector<1x128xf32> to vector<8x128xf32>
    %174 = arith.mulf %171, %173 : vector<8x128xf32>
    %c0_89 = arith.constant 0 : index
    %c0_90 = arith.constant 0 : index
    %175 = vector.load %arg8[%c0_89, %c0_90] : memref<1x128xf32, #tpu.memory_space<vmem>>, vector<1x128xf32>
    %176 = vector.broadcast %175 : vector<1x128xf32> to vector<8x128xf32>
    %177 = arith.addf %174, %176 : vector<8x128xf32>
    %178 = vector.shape_cast %177 : vector<8x128xf32> to vector<1x8x128xf32>
    %c0_91 = arith.constant 0 : index
    %c0_92 = arith.constant 0 : index
    %c0_93 = arith.constant 0 : index
    %179 = vector.load %arg10[%c0_91, %c0_92, %c0_93] : memref<1x8x128xf32, #tpu.memory_space<vmem>>, vector<1x8x128xf32>
    tpu.vector_store %arg10[%c0_91, %c0_92, %c0_93], %178 {strides = array<i32>} : memref<1x8x128xf32, #tpu.memory_space<vmem>>, vector<1x8x128xf32>,
    return
  }
  func.func @transform_0(%arg0: i32, %arg1: i32, %arg2: memref<16xi32, #tpu.memory_space<smem>>) -> (i32, i32) {
    %c1_i32 = arith.constant 1 : i32
    %0 = arith.muli %arg0, %c1_i32 : i32
    %1 = arith.addi %0, %arg1 : i32
    %c0_i32 = arith.constant 0 : i32
    %c0_i32_0 = arith.constant 0 : i32
    return %1, %c0_i32 : i32, i32
  }
  func.func @transform_1(%arg0: i32, %arg1: i32, %arg2: memref<16xi32, #tpu.memory_space<smem>>) -> (i32, i32) {
    %c1_i32 = arith.constant 1 : i32
    %0 = arith.muli %arg0, %c1_i32 : i32
    %1 = arith.addi %0, %arg1 : i32
    %c0_i32 = arith.constant 0 : i32
    %c0_i32_0 = arith.constant 0 : i32
    return %1, %c0_i32 : i32, i32
  }
  func.func @transform_2(%arg0: i32, %arg1: i32, %arg2: memref<16xi32, #tpu.memory_space<smem>>) -> (i32, i32) {
    %c0_i32 = arith.constant 0 : i32
    %c0_i32_0 = arith.constant 0 : i32
    %c0_i32_1 = arith.constant 0 : i32
    return %c0_i32, %c0_i32_0 : i32, i32
  }
  func.func @transform_3(%arg0: i32, %arg1: i32, %arg2: memref<16xi32, #tpu.memory_space<smem>>) -> (i32, i32) {
    %c0_i32 = arith.constant 0 : i32
    %c0_i32_0 = arith.constant 0 : i32
    %c0_i32_1 = arith.constant 0 : i32
    return %c0_i32, %c0_i32_0 : i32, i32
  }
  func.func @transform_4(%arg0: i32, %arg1: i32, %arg2: memref<16xi32, #tpu.memory_space<smem>>) -> (i32, i32) {
    %c0_i32 = arith.constant 0 : i32
    %c0_i32_0 = arith.constant 0 : i32
    %c0_i32_1 = arith.constant 0 : i32
    return %c0_i32, %c0_i32_0 : i32, i32
  }
  func.func @transform_5(%arg0: i32, %arg1: i32, %arg2: memref<16xi32, #tpu.memory_space<smem>>) -> (i32, i32) {
    %c0_i32 = arith.constant 0 : i32
    %c0_i32_0 = arith.constant 0 : i32
    %c0_i32_1 = arith.constant 0 : i32
    return %c0_i32, %c0_i32_0 : i32, i32
  }
  func.func @transform_7(%arg0: i32, %arg1: i32, %arg2: memref<16xi32, #tpu.memory_space<smem>>) -> (i32, i32, i32) {
    %c0_i32 = arith.constant 0 : i32
    %c0_i32_0 = arith.constant 0 : i32
    return %arg0, %arg1, %c0_i32 : i32, i32, i32
  }
}

</mosaic_0001>

<bundles_post_ra>
// kernel: tpu_custom_call.1
= control target key start
LH: loop header
LB: loop body
LE: loop exit
PB: predicated region body
PF: predicated region fallthrough
CT: control target
= control target key end

     0   :  { %s1126_s30 = smov [#allocation5]   ;;  %s1412_s0 = inlined_call_operand.vmem [shape: s32[16], index: 0, kind: input, shape index: {}]   ;;  %s1413_s1 = inlined_call_operand.vmem [shape: s32[16,1], index: 1, kind: input, shape index: {}]   ;;  %s1414_s2 = inlined_call_operand.vmem [shape: s32[16,1], index: 2, kind: input, shape index: {}]   ;;  %s1415_s3 = inlined_call_operand.vmem [shape: f32[16,128], index: 3, kind: input, shape index: {}]   ;;  %s1416_s4 = inlined_call_operand.vmem [shape: f32[2,128], index: 4, kind: input, shape index: {}]   ;;  %s1417_s5 = inlined_call_operand.vmem [shape: f32[1,128], index: 5, kind: input, shape index: {}]   ;;  %s1418_s6 = inlined_call_operand.vmem [shape: f32[1,128], index: 6, kind: input, shape index: {}]   ;;  %s1419_s7 = inlined_call_operand.hbm [shape: f32[64,128], index: 7, kind: input, shape index: {}]   ;;  %s1420_s8 = inlined_call_operand.hbm [shape: f32[2,8,128], index: 8, kind: output, shape index: {}]  }
   0x1   :  { %1429 = sst [smem:[#allocation43_spill]] %s1413_s1  ;;  %s14_s29 = sshll.u32 %s1412_s0, 4  ;;  %s15_s29 = int_to_ptr.vmem [resolvable:$true] %s14_s29 }
   0x2   :  { %17 = dma.vmem_to_smem %s15_s29, 16, %s1126_s30, [#allocation4] }
   0x3   :  { %1080 = dma.done.wait [#allocation4], 16 }
   0x4   :  { %1081 = vsyncadd [#allocation4], 4294967280 }
   0x5   :  { %20 = sfence }
   0x6   :  { %21 = vsyncpa [#allocation7], 0 }
   0x7   :  { %23 = vsyncpa [#allocation7 + $0x1], 0  ;;  %s1186_s9 = smov 0   ;;  %s1188_s10 = smov 0  }
   0x8   :  { %s1190_s11 = smov 0   ;;  %s1192_s12 = smov 0  }
   0x9   :  { %s1194_s13 = smov 0   ;;  %s1196_s14 = smov 0  }
   0xa LB: > { %1430 = sst [smem:[#allocation36_spill]] %s1104_s9  ;;  %s720_s0 = sadd.s32 4294967295, %s1124_s14   ;;  %s1124_s14 = sphi %s1196_s14, %s29_s14   ;;  %s1120_s13 = sphi %s1194_s13, %s1454_s13   ;;  %s1116_s12 = sphi %s1192_s12, %s1450_s12   ;;  %s1112_s11 = sphi %s1190_s11, %s1449_s11   ;;  %s1108_s10 = sphi %s1188_s10, %s1453_s10   ;;  %s1104_s9 = sphi %s1186_s9, %s1452_s9  }
   0xb   : > { %1431 = sst [smem:[#allocation37_spill]] %s1112_s11  ;;  %s721_s15 = sadd.s32 4294967294, %s1124_s14  }
   0xc   : > { %1432 = sst [smem:[#allocation38_spill]] %s1120_s13  ;;  %s41_s16 = sadd.s32 1, %s1120_s13 }
   0xd   : > { %s190_s17 = sadd.s32 1, %s1112_s11  ;;  %p43_p0 = scmp.ge.s32.totalorder %s41_s16, 2 }
   0xe   : > { %p200_p1 = scmp.ne.s32.totalorder %s1112_s11, %s1108_s10  ;;  %p201_p2 = scmp.eq.s32.totalorder %s720_s0, 1 }
   0xf   : > { %p206_p3 = scmp.ne.s32.totalorder %s1108_s10, %s1104_s9  ;;  %s1456_s16 = smov (%p43_p0, %s41_s16), 0 }
  0x10   : > { %1433 = sst [smem:[#allocation39_spill]] %s1456_s16  ;;  %p1224_p4 = por %p201_p2, %p200_p1 }
  0x11   : > { %p207_p5 = scmp.eq.s32.totalorder %s721_s15, 1  ;;  %s185_s19 = ssub.s32 %s1120_s13, %s1456_s16 }
  0x12   : > { %p724_p6 = scmp.ge.s32.totalorder %s1124_s14, 1  ;;  %p188_p7 = scmp.eq.s32.totalorder %s185_s19, 0 }
  0x13   : > { %p1231_p8 = por %p207_p5, %p206_p3  ;;  %p255_p9 = scmp.lt.s32.totalorder %s1124_s14, 3 }
  0x14   : > { %s1237_s21 = scalar_select %p188_p7, %s1112_s11, %s190_s17  }
  0x15   : > { %s1435_s20 = scalar_select %p1231_p8, 1, 0 }
  0x16   : > { %1437 = sst [smem:[#allocation41_spill]] %s1237_s21  ;;  %p256_p10 = pnand %p724_p6, %p255_p9 }
  0x17   : > { %1436 = sst [smem:[#allocation40_spill]] %s1435_s20 }
  0x18   : > { %259 = sbr.rel (%p256_p10) target bundleno = 674 (0x2a2), region = 44 }
  0x1d   : > { %s1421_s22 = sand.u32 1, %s1108_s10   ;;  %p291_p11 = scmp.lt.s32.totalorder %s1116_s12, 1 }
  0x1e   : > { %s1242_s23 = sshll.u32 %s1421_s22, 3  ;;  %s1244_s24 = sshll.u32 %s1116_s12, 3 }
  0x1f   : > { %s304_s25 = sld [smem:[#allocation5 + %s1244_s24]]  ;;  %s1458_s12 = smov (!%p291_p11, %s1116_s12), 1 }
  0x20   : > { %s319_s26 = sadd.s32 1, %s1244_s24  ;;  %s726_s27 = sshll.u32 %s1458_s12, 3 }
  0x21   : > { %s1127_s28 = smov [#allocation2]   ;;  %s1438_s1 = sld [smem:[#allocation43_spill]] }
  0x22   : > { %s315_s29 = sshll.u32 %s1127_s28, 4  ;;  %s1256_s22 = scalar_lea.vmem %s1414_s2, %s726_s27  ;;  %s316_s29 = int_to_ptr.vmem [resolvable:$true] %s315_s29 }
  0x23   : > { %s320_s16 = sld [smem:[#allocation5 + %s319_s26]]  ;;  %s1128_s12 = smov [#allocation2 + $0x1]  }
  0x24   : > { %s1261_s9 = sshll.u32 %s1128_s12, 4  ;;  %s1267_s17 = scalar_lea.hbm %s1419_s7, 64 }
  0x25   : > { %s305_s11 = scalar_lea.hbm %s1419_s7, %s304_s25  ;;  %1439 = sst [smem:[#allocation42_spill]] %s1261_s9 }
  0x26   : > { %s313_s20 = sshll.u32 %s305_s11, 4  ;;  %s314_s20 = int_to_ptr.hbm [resolvable:$true] %s313_s20 }
  0x27   : > { %s1251_s15 = scalar_lea.vmem %s1438_s1, %s726_s27  ;;  %s836_s28 = sshra.s32 %s314_s20, 4  ;;  %s837_s28 = int_to_ptr.hbm [resolvable:$true] %s836_s28 }
  0x28   : > { %s838_s30 = scalar_lea.hbm %s837_s28, 1  ;;  %p841_p13 = scmp.lt.s32.totalorder %s837_s28, %s1419_s7 }
  0x29   : > { %p839_p12 = scmp.ne.s32.totalorder %s837_s28, %s838_s30  ;;  %p842_p0 = scmp.lt.s32.totalorder %s1267_s17, %s838_s30 }
  0x2b   : > { %p843_p1 = por %p842_p0, %p841_p13 }
  0x2d   : > { %p844_p2 = pnand %p843_p1, %p839_p12 }
  0x2f   : > { %847 = shalt.err (!%p844_p2)  }
  0x30   : > { %318 = dma.hbm_to_vmem [thread:$0]  %s314_s20, 16, %s316_s29, [#allocation3] }
  0x31   : > { %s337_s11 = sadd.s32 2, %s1244_s24  ;;  %s321_s25 = scalar_lea.hbm %s1419_s7, %s320_s16 }
  0x32   : > { %s338_s12 = sld [smem:[#allocation5 + %s337_s11]]  ;;  %s331_s0 = sshll.u32 %s321_s25, 4  ;;  %s332_s0 = int_to_ptr.hbm [resolvable:$true] %s331_s0 }
  0x33   : > { %s1129_s27 = smov [#allocation2 + $0x2]   ;;  %s860_s28 = sshra.s32 %s332_s0, 4  ;;  %s861_s28 = int_to_ptr.hbm [resolvable:$true] %s860_s28 }
  0x34   : > { %s1277_s9 = sshll.u32 %s1129_s27, 4  ;;  %s862_s30 = scalar_lea.hbm %s861_s28, 1  ;;  %s352_s9 = int_to_ptr.vmem [resolvable:$true] %s1277_s9 }
  0x35   : > { %p863_p3 = scmp.ne.s32.totalorder %s861_s28, %s862_s30  ;;  %p865_p5 = scmp.lt.s32.totalorder %s861_s28, %s1419_s7 }
  0x36   : > { %p866_p6 = scmp.lt.s32.totalorder %s1267_s17, %s862_s30 }
  0x38   : > { %p867_p7 = por %p866_p6, %p865_p5 }
  0x3a   : > { %p868_p9 = pnand %p867_p7, %p863_p3 }
  0x3c   : > { %871 = shalt.err (!%p868_p9)  }
  0x3d   : > { %s1440_s16 = sld [smem:[#allocation42_spill]]  ;;  %s355_s19 = sadd.s32 3, %s1244_s24 }
  0x3e   : > { %s356_s11 = sld [smem:[#allocation5 + %s355_s19]]  ;;  %s1130_s13 = smov [#allocation2 + $0x3]  }
  0x3f   : > { %s1287_s21 = sshll.u32 %s1130_s13, 4  ;;  %s339_s28 = scalar_lea.hbm %s1419_s7, %s338_s12 }
  0x40   : > { %1442 = sst [smem:[#allocation42_spill]] %s1287_s21  ;;  %s349_s30 = sshll.u32 %s339_s28, 4  ;;  %s350_s30 = int_to_ptr.hbm [resolvable:$true] %s349_s30 }
  0x41   : > { %s373_s20 = sadd.s32 4, %s1244_s24 }
  0x42   : > { %s1294_s29 = sld [smem:[#allocation5 + %s373_s20]] }
  0x43   : > { %s1441_s26 = int_to_ptr.vmem [resolvable:$true] %s1440_s16  ;;  %s884_s16 = sshra.s32 %s350_s30, 4  ;;  %s885_s16 = int_to_ptr.hbm [resolvable:$true] %s884_s16 }
  0x44   : > { %336 = dma.hbm_to_vmem [thread:$0]  %s332_s0, 16, %s1441_s26, [#allocation3 + $0x1] }
  0x45   : > { %s886_s0 = scalar_lea.hbm %s885_s16, 1  ;;  %p889_p11 = scmp.lt.s32.totalorder %s885_s16, %s1419_s7 }
  0x46   : > { %p887_p10 = scmp.ne.s32.totalorder %s885_s16, %s886_s0  ;;  %p890_p12 = scmp.lt.s32.totalorder %s1267_s17, %s886_s0 }
  0x48   : > { %p891_p13 = por %p890_p12, %p889_p11 }
  0x4a   : > { %p892_p0 = pnand %p891_p13, %p887_p10 }
  0x4c   : > { %895 = shalt.err (!%p892_p0)  }
  0x4d   : > { %354 = dma.hbm_to_vmem [thread:$0]  %s350_s30, 16, %s352_s9, [#allocation3 + $0x2] }
  0x4e   : > { %s391_s12 = sadd.s32 5, %s1244_s24  ;;  %s357_s27 = scalar_lea.hbm %s1419_s7, %s356_s11 }
  0x4f   : > { %s1131_s28 = smov [#allocation2 + $0x4]   ;;  %s367_s26 = sshll.u32 %s357_s27, 4  ;;  %s368_s26 = int_to_ptr.hbm [resolvable:$true] %s367_s26 }
  0x50   : > { %s1306_s20 = sshll.u32 %s1131_s28, 4  ;;  %s1309_s16 = sld [smem:[#allocation5 + %s391_s12]]  ;;  %s388_s20 = int_to_ptr.vmem [resolvable:$true] %s1306_s20 }
  0x51   : > { %s908_s0 = sshra.s32 %s368_s26, 4  ;;  %s909_s0 = int_to_ptr.hbm [resolvable:$true] %s908_s0 }
  0x52   : > { %s910_s19 = scalar_lea.hbm %s909_s0, 1  ;;  %p913_p2 = scmp.lt.s32.totalorder %s909_s0, %s1419_s7 }
  0x53   : > { %p911_p1 = scmp.ne.s32.totalorder %s909_s0, %s910_s19  ;;  %p914_p3 = scmp.lt.s32.totalorder %s1267_s17, %s910_s19 }
  0x55   : > { %p915_p5 = por %p914_p3, %p913_p2 }
  0x57   : > { %p916_p6 = pnand %p915_p5, %p911_p1 }
  0x59   : > { %919 = shalt.err (!%p916_p6)  }
  0x5a   : > { %s1443_s11 = sld [smem:[#allocation42_spill]]  ;;  %s375_s25 = scalar_lea.hbm %s1419_s7, %s1294_s29 }
  0x5b   : > { %s385_s27 = sshll.u32 %s375_s25, 4  ;;  %s1132_s28 = smov [#allocation2 + $0x5]   ;;  %s386_s27 = int_to_ptr.hbm [resolvable:$true] %s385_s27 }
  0x5c   : > { %s405_s1 = sshll.u32 %s1132_s28, 4  ;;  %s932_s21 = sshra.s32 %s386_s27, 4  ;;  %s406_s1 = int_to_ptr.vmem [resolvable:$true] %s405_s1  ;;  %s933_s21 = int_to_ptr.hbm [resolvable:$true] %s932_s21 }
  0x5d   : > { %s934_s0 = scalar_lea.hbm %s933_s21, 1  ;;  %p937_p9 = scmp.lt.s32.totalorder %s933_s21, %s1419_s7 }
  0x5e   : > { %p935_p7 = scmp.ne.s32.totalorder %s933_s21, %s934_s0  ;;  %p938_p10 = scmp.lt.s32.totalorder %s1267_s17, %s934_s0 }
  0x60   : > { %s1444_s30 = int_to_ptr.vmem [resolvable:$true] %s1443_s11  ;;  %p939_p11 = por %p938_p10, %p937_p9 }
  0x61   : > { %372 = dma.hbm_to_vmem [thread:$0]  %s368_s26, 16, %s1444_s30, [#allocation3 + $0x3] }
  0x62   : > { %p940_p12 = pnand %p939_p11, %p935_p7 }
  0x64   : > { %943 = shalt.err (!%p940_p12)  }
  0x65   : > { %390 = dma.hbm_to_vmem [thread:$0]  %s386_s27, 16, %s388_s20, [#allocation3 + $0x4] }
  0x66   : > { %s393_s11 = scalar_lea.hbm %s1419_s7, %s1309_s16  ;;  %s409_s30 = sadd.s32 6, %s1244_s24 }
  0x67   : > { %s403_s13 = sshll.u32 %s393_s11, 4  ;;  %s410_s12 = sld [smem:[#allocation5 + %s409_s30]]  ;;  %s404_s13 = int_to_ptr.hbm [resolvable:$true] %s403_s13 }
  0x68   : > { %s956_s25 = sshra.s32 %s404_s13, 4  ;;  %s957_s25 = int_to_ptr.hbm [resolvable:$true] %s956_s25 }
  0x69   : > { %s958_s28 = scalar_lea.hbm %s957_s25, 1  ;;  %p961_p0 = scmp.lt.s32.totalorder %s957_s25, %s1419_s7 }
  0x6a   : > { %p959_p13 = scmp.ne.s32.totalorder %s957_s25, %s958_s28  ;;  %p962_p1 = scmp.lt.s32.totalorder %s1267_s17, %s958_s28 }
  0x6c   : > { %p963_p2 = por %p962_p1, %p961_p0 }
  0x6e   : > { %p964_p3 = pnand %p963_p2, %p959_p13 }
  0x70   : > { %967 = shalt.err (!%p964_p3)  }
  0x71   : > { %408 = dma.hbm_to_vmem [thread:$0]  %s404_s13, 16, %s406_s1, [#allocation3 + $0x5] }
  0x72   : > { %s1133_s20 = smov [#allocation2 + $0x6]   ;;  %s427_s27 = sadd.s32 7, %s1244_s24 }
  0x73   : > { %s423_s16 = sshll.u32 %s1133_s20, 4  ;;  %s428_s19 = sld [smem:[#allocation5 + %s427_s27]]  ;;  %s424_s16 = int_to_ptr.vmem [resolvable:$true] %s423_s16 }
  0x74   : > { %s411_s26 = scalar_lea.hbm %s1419_s7, %s410_s12  ;;  %s1134_s30 = smov [#allocation2 + $0x7]  }
  0x75   : > { %s421_s11 = sshll.u32 %s411_s26, 4  ;;  %s441_s21 = sshll.u32 %s1134_s30, 4  ;;  %s422_s11 = int_to_ptr.hbm [resolvable:$true] %s421_s11  ;;  %s442_s21 = int_to_ptr.vmem [resolvable:$true] %s441_s21 }
  0x76   : > { %s980_s25 = sshra.s32 %s422_s11, 4  ;;  %s981_s25 = int_to_ptr.hbm [resolvable:$true] %s980_s25 }
  0x77   : > { %s982_s28 = scalar_lea.hbm %s981_s25, 1  ;;  %p985_p6 = scmp.lt.s32.totalorder %s981_s25, %s1419_s7 }
  0x78   : > { %p983_p5 = scmp.ne.s32.totalorder %s981_s25, %s982_s28  ;;  %p986_p7 = scmp.lt.s32.totalorder %s1267_s17, %s982_s28 }
  0x7a   : > { %p987_p9 = por %p986_p7, %p985_p6 }
  0x7c   : > { %p988_p10 = pnand %p987_p9, %p983_p5 }
  0x7e   : > { %991 = shalt.err (!%p988_p10)  }
  0x7f   : > { %426 = dma.hbm_to_vmem [thread:$0]  %s422_s11, 16, %s424_s16, [#allocation3 + $0x6] }
  0x80   : > { %s429_s20 = scalar_lea.hbm %s1419_s7, %s428_s19 }
  0x81   : > { %s439_s27 = sshll.u32 %s429_s20, 4  ;;  %s440_s27 = int_to_ptr.hbm [resolvable:$true] %s439_s27 }
  0x82   : > { %s1004_s9 = sshra.s32 %s440_s27, 4  ;;  %s1005_s9 = int_to_ptr.hbm [resolvable:$true] %s1004_s9 }
  0x83   : > { %s1006_s29 = scalar_lea.hbm %s1005_s9, 1  ;;  %p1009_p12 = scmp.lt.s32.totalorder %s1005_s9, %s1419_s7 }
  0x84   : > { %p1007_p11 = scmp.ne.s32.totalorder %s1005_s9, %s1006_s29  ;;  %p1010_p13 = scmp.lt.s32.totalorder %s1267_s17, %s1006_s29 }
  0x86   : > { %p1011_p0 = por %p1010_p13, %p1009_p12 }
  0x88   : > { %p1012_p1 = pnand %p1011_p0, %p1007_p11 }
  0x8a   : > { %1015 = shalt.err (!%p1012_p1)  }
  0x8b   : > { %444 = dma.hbm_to_vmem [thread:$0]  %s440_s27, 16, %s442_s21, [#allocation3 + $0x7] }
  0x8c   : > { %s289_s16 = scalar_lea.vmem [#allocation6], %s1242_s23 }
  0x8d   : > { %1082 = dma.done.wait [#allocation3], 16 }
  0x8e   : > { %1083 = vsyncadd [#allocation3], 4294967280 }
  0x8f   : > { %1084 = dma.done.wait [#allocation3 + $0x1], 16 }
  0x90   : > { %1085 = vsyncadd [#allocation3 + $0x1], 4294967280 }
  0x91   : > { %1086 = dma.done.wait [#allocation3 + $0x2], 16 }
  0x92   : > { %1087 = vsyncadd [#allocation3 + $0x2], 4294967280 }
  0x93   : > { %1088 = dma.done.wait [#allocation3 + $0x3], 16 }
  0x94   : > { %1089 = vsyncadd [#allocation3 + $0x3], 4294967280 }
  0x95   : > { %1090 = dma.done.wait [#allocation3 + $0x4], 16 }
  0x96   : > { %1091 = vsyncadd [#allocation3 + $0x4], 4294967280 }
  0x97   : > { %1092 = dma.done.wait [#allocation3 + $0x5], 16 }
  0x98   : > { %1093 = vsyncadd [#allocation3 + $0x5], 4294967280 }
  0x99   : > { %1094 = dma.done.wait [#allocation3 + $0x6], 16 }
  0x9a   : > { %1095 = vsyncadd [#allocation3 + $0x6], 4294967280 }
  0x9b   : > { %1096 = dma.done.wait [#allocation3 + $0x7], 16 }
  0x9c   : > { %1097 = vsyncadd [#allocation3 + $0x7], 4294967280  ;;  %v1135_v0 = vmov 0   ;;  %v462_v1 = vld [vmem:[%s1251_s15] sm:$0xff]  ;;  %v472_v3 = vld [vmem:[%s1415_s3 + $0x8] sm:$0xff]  ;;  %v1136_v4 = vmov 0.0   ;;  %v463_v9 = vlaneseq  ;;  %s572_s20 = scalar_lea.hbm %s1420_s8, %s1244_s24 }
  0x9d   : > { %810 = vset.pattern.permute.xlu0 %v1135_v0  ;;  %v497_v2 = vld [vmem:[%s1256_s22] sm:$0xff]  ;;  %491 = vmatpush.msra.mxu0 %v472_v3  ;;  %vm473_vm2 = vcmask 130048   ;;  %v1137_v25 = vmov 128.0   ;;  %s574_s29 = sshll.u32 %s289_s16, 4  ;;  %s576_s26 = sshll.u32 %s572_s20, 4  ;;  %s575_s29 = int_to_ptr.vmem [resolvable:$true] %s574_s29  ;;  %s577_s26 = int_to_ptr.hbm [resolvable:$true] %s576_s26 }
  0x9e   : > { %466 = vperm.xlu0 %810, %v462_v1   ;;  %vm499_vm0 = vcmp.eq.s32.totalorder %v497_v2, 0  ;;  %vm510_vm1 = vcmp.eq.s32.totalorder %v497_v2, 1  ;;  %v471_v8 = vld [vmem:[%s1415_s3] sm:$0xff]  ;;  %v464_v10 = vand.u32 127, %v463_v9  ;;  %820 = vrcp.f32 %v1137_v25  ;;  %s1445_s30 = sand.u32 1, %s1108_s10   ;;  %s1042_s19 = sshra.s32 %s577_s26, 4  ;;  %s1043_s19 = int_to_ptr.hbm [resolvable:$true] %s1042_s19 }
  0x9f   : > { %v500_v5 = vsel %vm499_vm0, 1.0, %v1136_v4  ;;  %v511_v6 = vsel %vm510_vm1, 1.0, %v1136_v4  ;;  %492 = vmatpush.msra.mxu0 %v471_v8  ;;  %v816_v14 = vld [vmem:[%s1416_s4] ss:$0 sm:$0xff]  ;;  %v817_v15 = vld [vmem:[%s1416_s4 + $0x1] ss:$0 sm:$0xff]  ;;  %p1049_p6 = scmp.lt.s32.totalorder %s1043_s19, %s1420_s8 }
  0xa0   : > { %v811_v7 = vpack.i.bf16 %v511_v6, %v500_v5  ;;  %v461_v20 = vld [vmem:[#allocation2] sm:$0xff]  ;;  %s561_s17 = scalar_lea.sflag [#allocation7], %s1445_s30  ;;  %s1044_s24 = scalar_lea.hbm %s1043_s19, 8 }
  0xa1   : > { %v818_v45 = vld [vmem:[%s1417_s5] ss:$0 sm:$0xff]  ;;  %p1045_p2 = scmp.ne.s32.totalorder %s1043_s19, %s1044_s24  ;;  %s1048_s22 = scalar_lea.hbm %s1420_s8, 16 }
  0xa2   : > { %v819_v48 = vld [vmem:[%s1418_s6] ss:$0 sm:$0xff]  ;;  %p1050_p7 = scmp.lt.s32.totalorder %s1048_s22, %s1044_s24 }
  0xa3   : > { %p1046_p3 = pnand %p1045_p2, %p1224_p4 }
  0xa4   : > { %v821_v26 = vpop.eup %820  ;;  %p1051_p9 = por %p1050_p7, %p1049_p6 }
  0xa5   : > { %v525_v27 = vmul.f32 128.0, %v821_v26  ;;  %vm529_vm4 = vweird.f32 %v821_v26  ;;  %p1047_p5 = pneg %p1046_p3 }
  0xa6   : > { %812 = vperm.xlu0 %810, %v811_v7  }
  0xa7   : > { %v526_v28 = vsub.f32 1.0, %v525_v27  ;;  %p1052_p10 = pnand %p1051_p9, %p1047_p5 }
  0xa9   : > { %v527_v29 = vmul.f32 %v821_v26, %v526_v28 }
  0xab   : > { %v528_v30 = vadd.f32 %v821_v26, %v527_v29 }
  0xad   : > { %v530_v31 = vsel %vm529_vm4, %v821_v26, %v528_v30 }
 0x110   : > { %v467_v11 = vpop.permute.xlu0 %466 }
 0x111   : > { %vm468_vm3 = vcmp.eq.s32.totalorder %v467_v11, %v464_v10 }
 0x112   : > { %v729_v12 = vsel %vm468_vm3, 1.0, %v1136_v4 }
 0x113   : > { %730 = vmatmul.msk.f32.vlgmr.msra.gmra.mxu0 %vm473_vm2, %v729_v12 }
 0x118   : > { %v813_v13 = vpop.permute.xlu0 %812 }
 0x119   : > { %v815_v16 = vunpack.i.h.bf16 %v813_v13  ;;  %v814_v17 = vunpack.i.l.bf16 %v813_v13 }
 0x11b   : > { %v518_v18 = vmul.f32 %v817_v15, %v815_v16  ;;  %v507_v19 = vmul.f32 %v816_v14, %v814_v17 }
 0x11d   : > { %v519_v23 = vadd.f32 %v518_v18, %v507_v19 }
 0x190   : > { %v494_v21 = vpop.f32.mrf.mxu0 }
 0x191   : > { %v520_v22 = vadd.f32 %v494_v21, %v461_v20 }
 0x193   : > { %v521_v24 = vadd.f32 %v520_v22, %v519_v23 }
 0x195   : > { %522 = vadd.xlane.f32.xlu1 %v521_v24 }
 0x208   : > { %v523_v32 = vpop.xlane.xlu1 %522 }
 0x209   : > { %v531_v33 = vmul.f32 %v530_v31, %v523_v32 }
 0x20b   : > { %v532_v34 = vsub.f32 %v521_v24, %v531_v33 }
 0x20d   : > { %v533_v35 = vmul.f32 %v532_v34, %v532_v34 }
 0x20f   : > { %534 = vadd.xlane.f32.xlu1 %v533_v35 }
 0x282   : > { %v535_v36 = vpop.xlane.xlu1 %534 }
 0x283   : > { %v536_v37 = vmul.f32 %v535_v36, %v530_v31 }
 0x285   : > { %v537_v38 = vadd.f32 1e-12, %v536_v37 }
 0x287   : > { %822 = vrsqrt.f32 %v537_v38  ;;  %vm544_vm6 = vweird.f32 %v537_v38 }
 0x28d   : > { %v823_v39 = vpop.eup %822 }
 0x28e   : > { %v539_v40 = vmul.f32 %v823_v39, %v537_v38  ;;  %vm545_vm5 = vweird.f32 %v823_v39 }
 0x28f   : > { %vm546_vm7 = vmor %vm544_vm6, %vm545_vm5 }
 0x290   : > { %v540_v41 = vmul.f32 %v823_v39, %v539_v40 }
 0x292   : > { %v541_v42 = vmul.f32 0.5, %v540_v41 }
 0x294   : > { %v542_v43 = vsub.f32 1.5, %v541_v42 }
 0x296   : > { %v543_v44 = vmul.f32 %v823_v39, %v542_v43 }
 0x298   : > { %v547_v46 = vsel %vm546_vm7, %v823_v39, %v543_v44 }
 0x299   : > { %v548_v47 = vmul.f32 %v547_v46, %v532_v34 }
 0x29b   : > { %v553_v49 = vmul.f32 %v818_v45, %v548_v47 }
 0x29d   : > { %v558_v50 = vadd.f32 %v819_v48, %v553_v49 }
 0x29f   : > { %559 = vst [vmem:[%s289_s16] sm:$0xff] %v558_v50 }
 0x2a0   : > { %1055 = shalt.err (!%p1052_p10)
}
 0x2a1   : > { %743 = dma.vmem_to_hbm [thread:$0]  (%p1224_p4), %s575_s29, 128, %s577_s26, %s561_s17  }
 0x2a2 PF: > { %s1446_s23 = sld [smem:[#allocation36_spill]]  ;;  %p749_p11 = scmp.ge.s32.totalorder %s1124_s14, 2 }
 0x2a4   : > { %p746_p12 = pnand %p749_p11, %p1231_p8 }
 0x2a6   : > { %p747_p13 = pneg %p746_p12 }
 0x2a8   : > { %s588_s28 = sand.u32 1, %s1446_s23  }
 0x2a9   : > { %s589_s1 = scalar_lea.sflag [#allocation7], %s588_s28 }
 0x2aa   : > { %1099 = dma.done.wait (%p747_p13), %s589_s1, 128  }
 0x2ab   : > { %1101 = vsyncadd (%p747_p13), %s589_s1, 4294967168  ;;  %s29_s14 = sadd.s32 1, %s1124_s14   ;;  %s1448_s13 = sld [smem:[#allocation37_spill]] }
 0x2ac   : > { %p26_p0 = scmp.ge.s32.totalorder %s29_s14, 4   ;;  %s1449_s11 = sld [smem:[#allocation41_spill]] }
 0x2ad   : > { %s1450_s12 = sld [smem:[#allocation38_spill]]  ;;  %s1452_s9 = smov %s1108_s10 }
 0x2ae   : > { %s1451_s18 = sld [smem:[#allocation39_spill]] }
 0x2b0   :  { %28 = sbr.rel (!%p26_p0) target bundleno = 10 (0xa), region = 143 }
 0x2b1   : > { %s1453_s10 = smov %s1448_s13 }
 0x2b4   : > { %s1454_s13 = smov %s1451_s18 }
 0x2b5   :  { %595 = vsyncpa [#allocation7], 1 }
 0x2b6   :  { %597 = vsyncpa [#allocation7 + $0x1], 1 }
 0x2b7   :  { %598 = vsyncmov [#allocation3] }
 0x2ba   :  { %s599_s0 = vpop.sfrf %598 }
 0x2bb   :  { %p735_p4 = scmp.ne.s32.totalorder %s599_s0, 0 }
 0x2bd   :  { %603 = shalt.err (%p735_p4)  }
 0x2be   :  { %605 = vsyncmov [#allocation3 + $0x1] }
 0x2c1   :  { %s606_s20 = vpop.sfrf %605 }
 0x2c2   :  { %p736_p8 = scmp.ne.s32.totalorder %s606_s20, 0 }
 0x2c4   :  { %610 = shalt.err (%p736_p8)  }
 0x2c5   :  { %612 = vsyncmov [#allocation3 + $0x2] }
 0x2c8   :  { %s613_s27 = vpop.sfrf %612 }
 0x2c9   :  { %p737_p1 = scmp.ne.s32.totalorder %s613_s27, 0 }
 0x2cb   :  { %617 = shalt.err (%p737_p1)  }
 0x2cc   :  { %619 = vsyncmov [#allocation3 + $0x3] }
 0x2cf   :  { %s620_s29 = vpop.sfrf %619 }
 0x2d0   :  { %p738_p2 = scmp.ne.s32.totalorder %s620_s29, 0 }
 0x2d2   :  { %624 = shalt.err (%p738_p2)  }
 0x2d3   :  { %626 = vsyncmov [#allocation3 + $0x4] }
 0x2d6   :  { %s627_s14 = vpop.sfrf %626 }
 0x2d7   :  { %p739_p3 = scmp.ne.s32.totalorder %s627_s14, 0 }
 0x2d9   :  { %631 = shalt.err (%p739_p3)  }
 0x2da   :  { %633 = vsyncmov [#allocation3 + $0x5] }
 0x2dd   :  { %s634_s2 = vpop.sfrf %633 }
 0x2de   :  { %p740_p5 = scmp.ne.s32.totalorder %s634_s2, 0 }
 0x2e0   :  { %638 = shalt.err (%p740_p5)  }
 0x2e1   :  { %640 = vsyncmov [#allocation3 + $0x6] }
 0x2e4   :  { %s641_s3 = vpop.sfrf %640 }
 0x2e5   :  { %p741_p6 = scmp.ne.s32.totalorder %s641_s3, 0 }
 0x2e7   :  { %645 = shalt.err (%p741_p6)  }
 0x2e8   :  { %647 = vsyncmov [#allocation3 + $0x7] }
 0x2eb   :  { %s648_s4 = vpop.sfrf %647 }
 0x2ec   :  { %p742_p7 = scmp.ne.s32.totalorder %s648_s4, 0 }
 0x2ee   :  { %652 = shalt.err (%p742_p7)  }

</bundles_post_ra>
